<compile_context>
chip_gen: v5e
topology: v5e:2x2
jax: 0.10.0
libtpu: 0.0.40
codegen_flags: <defaults>
</compile_context>

<pallas_src>
import functools
import math

import jax
import jax.numpy as jnp
from jax.experimental import pallas as pl
from jax.experimental.pallas import tpu as pltpu

_LANES = 128
_SUBLANES = 8


def _kinetic_kernel(x_ref, ksum_ref):
    """Pass 1: accumulate sum((x1 - x0)^2) over all tiles into a (1,1) output."""
    @pl.when(pl.program_id(0) == 0)
    def _():
        ksum_ref[...] = jnp.zeros_like(ksum_ref)

    d = x_ref[1] - x_ref[0]                     # (tm, 128) f32
    ksum_ref[...] += jnp.sum(d * d, keepdims=True)


def _potential_kernel(dt_ref, ksum_ref, x_ref, o_ref):
    """Pass 2: out = (scale*ksum + dt) - dt*cos((x0+x1)/2), lane-dense tiles."""
    dt = dt_ref[0, 0]                            # SMEM scalar
    # kinetic = 0.01/(2*dt) * sum(d^2); fold the "+1*dt" from -(-1+cos)*dt in.
    kin = ksum_ref[0, 0] * (0.005 / dt) + dt     # scalar, computed once per tile
    m = (x_ref[0] + x_ref[1]) * 0.5              # (tm, 128)
    o_ref[...] = kin - dt * jnp.cos(m)


@functools.partial(jax.jit, static_argnames=("tm_max",))
def action_piece(x, delta_t, tm_max=512):
    """x: (2, *dims) -> (*dims), matching ActionPiece(delta_t).forward(x)."""
    if x.shape[0] != 2:
        raise ValueError("leading dim of x must be 2")
    out_dims = x.shape[1:]
    n = math.prod(out_dims)

    # Lane-dense padded layout: (2, rows_pad, 128), rows_pad % tm == 0.
    rows = -(-n // _LANES)
    tm = min(tm_max, -(-rows // _SUBLANES) * _SUBLANES)
    tm = max(_SUBLANES, (tm // _SUBLANES) * _SUBLANES)
    rows_pad = -(-rows // tm) * tm
    n_pad = rows_pad * _LANES
    num_tiles = rows_pad // tm

    xf = x.reshape(2, n).astype(jnp.float32)
    if n_pad > n:
        xf = jnp.pad(xf, ((0, 0), (0, n_pad - n)))   # zero pad: contributes 0 to sum
    xl = xf.reshape(2, rows_pad, _LANES)

    dt = jnp.asarray(delta_t, jnp.float32).reshape(1, 1)

    # Pass 1: global reduction (resident (1,1) accumulator across the grid).
    ksum = pl.pallas_call(
        _kinetic_kernel,
        out_shape=jax.ShapeDtypeStruct((1, 1), jnp.float32),
        grid=(num_tiles,),
        in_specs=[pl.BlockSpec((2, tm, _LANES), lambda t: (0, t, 0))],
        out_specs=pl.BlockSpec((1, 1), lambda t: (0, 0)),
        compiler_params=pltpu.CompilerParams(dimension_semantics=("arbitrary",)),
    )(xl)

    # Pass 2: elementwise, embarrassingly parallel over tiles.
    out_flat = pl.pallas_call(
        _potential_kernel,
        out_shape=jax.ShapeDtypeStruct((rows_pad, _LANES), jnp.float32),
        grid=(num_tiles,),
        in_specs=[
            pl.BlockSpec(memory_space=pltpu.MemorySpace.SMEM),   # delta_t (1,1)
            pl.BlockSpec(memory_space=pltpu.MemorySpace.SMEM),   # ksum    (1,1)
            pl.BlockSpec((2, tm, _LANES), lambda t: (0, t, 0)),
        ],
        out_specs=pl.BlockSpec((tm, _LANES), lambda t: (t, 0)),
        compiler_params=pltpu.CompilerParams(dimension_semantics=("parallel",)),
    )(dt, ksum, xl)

    out = out_flat.reshape(n_pad)[:n].reshape(out_dims)
    return out.astype(x.dtype)


def _reference(x, delta_t):
    return (0.01 * (x[1] - x[0]) ** 2 / 2 / delta_t).sum() - (
        -1.0 + jnp.cos((x[1] + x[0]) / 2.0)
    ) * delta_t


if __name__ == "__main__":
    key = jax.random.PRNGKey(0)
    delta_t = 0.1  # ActionPiece(delta_t=0.1); no learnable parameters

    # Small shape matching the module's expected layout (2 time slices x grid).
    x = jax.random.normal(key, (2, 8, 16), dtype=jnp.float32)
    out = jax.block_until_ready(action_piece(x, delta_t))
    ref = _reference(x, delta_t)
    assert out.shape == ref.shape == (8, 16)
    assert jnp.allclose(out, ref, atol=1e-5, rtol=1e-5), "mismatch vs reference (small)"

    # Second case exercising the multi-tile grid + cross-tile accumulation path.
    x2 = jax.random.normal(jax.random.PRNGKey(1), (2, 32, 128), dtype=jnp.float32)
    out2 = jax.block_until_ready(action_piece(x2, delta_t, tm_max=8))  # 4 tiles
    ref2 = _reference(x2, delta_t)
    assert out2.shape == ref2.shape == (32, 128)
    assert jnp.allclose(out2, ref2, atol=1e-5, rtol=1e-5), "mismatch vs reference (tiled)"

    print("KERNEL_OK")
</pallas_src>

<mosaic_0001>
module attributes {stable_mosaic.version = 11 : i64} {
  func.func @_kinetic_kernel(%arg0: i32, %arg1: memref<2x8x128xf32, #tpu.memory_space<vmem>>, %arg2: memref<1x1xf32, #tpu.memory_space<vmem>>) attributes {dimension_semantics = [#tpu.dimension_semantics<arbitrary>], iteration_bounds = array<i64: 1>, scalar_prefetch = 0 : i64, scratch_operands = 0 : i64, tpu.core_type = #tpu.core_type<tc>, window_params = [{transform_indices = @transform_0, window_bounds = array<i64: 2, 8, 128>}, {pipeline_mode = #tpu.pipeline_mode<synchronous>, transform_indices = @transform_1, window_bounds = array<i64: 1, 1>}]} {
    %c0_i32 = arith.constant 0 : i32
    %0 = arith.cmpi eq, %arg0, %c0_i32 : i32
    %1 = arith.extui %0 : i1 to i32
    %c0_i32_0 = arith.constant 0 : i32
    %2 = arith.cmpi ne, %1, %c0_i32_0 : i32
    scf.if %2 {
      %cst_9 = arith.constant 0.000000e+00 : f32
      %17 = vector.broadcast %cst_9 : f32 to vector<1x1xf32>
      %c0_10 = arith.constant 0 : index
      %c0_11 = arith.constant 0 : index
      %18 = vector.load %arg2[%c0_10, %c0_11] : memref<1x1xf32, #tpu.memory_space<vmem>>, vector<1x1xf32>
      tpu.vector_store %arg2[%c0_10, %c0_11], %17 {strides = array<i32>} : memref<1x1xf32, #tpu.memory_space<vmem>>, vector<1x1xf32>,
    } else {
    }
    %c1 = arith.constant 1 : index
    %c0 = arith.constant 0 : index
    %c0_1 = arith.constant 0 : index
    %3 = vector.load %arg1[%c1, %c0, %c0_1] : memref<2x8x128xf32, #tpu.memory_space<vmem>>, vector<1x8x128xf32>
    %4 = vector.shape_cast %3 : vector<1x8x128xf32> to vector<8x128xf32>
    %c0_2 = arith.constant 0 : index
    %c0_3 = arith.constant 0 : index
    %c0_4 = arith.constant 0 : index
    %5 = vector.load %arg1[%c0_2, %c0_3, %c0_4] : memref<2x8x128xf32, #tpu.memory_space<vmem>>, vector<1x8x128xf32>
    %6 = vector.shape_cast %5 : vector<1x8x128xf32> to vector<8x128xf32>
    %7 = arith.subf %4, %6 : vector<8x128xf32>
    %c0_5 = arith.constant 0 : index
    %c0_6 = arith.constant 0 : index
    %8 = vector.load %arg2[%c0_5, %c0_6] : memref<1x1xf32, #tpu.memory_space<vmem>>, vector<1x1xf32>
    %9 = arith.mulf %7, %7 : vector<8x128xf32>
    %10 = vector.shape_cast %9 : vector<8x128xf32> to vector<1x8x128xf32>
    %cst = arith.constant dense<0.000000e+00> : vector<1xf32>
    %11 = vector.multi_reduction <add>, %10, %cst [1, 2] : vector<1x8x128xf32> to vector<1xf32>
    %12 = vector.shape_cast %11 : vector<1xf32> to vector<1x1x1xf32>
    %13 = vector.extract %12[0, 0, 0] : f32 from vector<1x1x1xf32>
    %14 = vector.broadcast %13 : f32 to vector<1x1xf32>
    %15 = arith.addf %8, %14 : vector<1x1xf32>
    %c0_7 = arith.constant 0 : index
    %c0_8 = arith.constant 0 : index
    %16 = vector.load %arg2[%c0_7, %c0_8] : memref<1x1xf32, #tpu.memory_space<vmem>>, vector<1x1xf32>
    tpu.vector_store %arg2[%c0_7, %c0_8], %15 {strides = array<i32>} : memref<1x1xf32, #tpu.memory_space<vmem>>, vector<1x1xf32>,
    return
  }
  func.func @transform_0(%arg0: i32) -> (i32, i32, i32) {
    %c0_i32 = arith.constant 0 : i32
    %c0_i32_0 = arith.constant 0 : i32
    %c0_i32_1 = arith.constant 0 : i32
    return %c0_i32, %arg0, %c0_i32_0 : i32, i32, i32
  }
  func.func @transform_1(%arg0: i32) -> (i32, i32) {
    %c0_i32 = arith.constant 0 : i32
    %c0_i32_0 = arith.constant 0 : i32
    %c0_i32_1 = arith.constant 0 : i32
    return %c0_i32, %c0_i32_0 : i32, i32
  }
}

module attributes {stable_mosaic.version = 11 : i64} {
  func.func @_potential_kernel(%arg0: i32, %arg1: memref<1x1xf32, #tpu.memory_space<smem>>, %arg2: memref<1x1xf32, #tpu.memory_space<smem>>, %arg3: memref<2x8x128xf32, #tpu.memory_space<vmem>>, %arg4: memref<8x128xf32, #tpu.memory_space<vmem>>) attributes {dimension_semantics = [#tpu.dimension_semantics<parallel>], iteration_bounds = array<i64: 1>, scalar_prefetch = 0 : i64, scratch_operands = 0 : i64, tpu.core_type = #tpu.core_type<tc>, window_params = [{transform_indices = @transform_0, window_bounds = array<i64: 1, 1>}, {transform_indices = @transform_1, window_bounds = array<i64: 1, 1>}, {transform_indices = @transform_2, window_bounds = array<i64: 2, 8, 128>}, {transform_indices = @transform_3, window_bounds = array<i64: 8, 128>}]} {
    %c0 = arith.constant 0 : index
    %c0_0 = arith.constant 0 : index
    %0 = memref.load %arg1[%c0, %c0_0] : memref<1x1xf32, #tpu.memory_space<smem>>
    %c0_1 = arith.constant 0 : index
    %c0_2 = arith.constant 0 : index
    %1 = memref.load %arg2[%c0_1, %c0_2] : memref<1x1xf32, #tpu.memory_space<smem>>
    %cst = arith.constant 5.000000e-03 : f32
    %2 = arith.divf %cst, %0 : f32
    %3 = arith.mulf %1, %2 : f32
    %4 = arith.addf %3, %0 : f32
    %c0_3 = arith.constant 0 : index
    %c0_4 = arith.constant 0 : index
    %c0_5 = arith.constant 0 : index
    %5 = vector.load %arg3[%c0_3, %c0_4, %c0_5] : memref<2x8x128xf32, #tpu.memory_space<vmem>>, vector<1x8x128xf32>
    %6 = vector.shape_cast %5 : vector<1x8x128xf32> to vector<8x128xf32>
    %c1 = arith.constant 1 : index
    %c0_6 = arith.constant 0 : index
    %c0_7 = arith.constant 0 : index
    %7 = vector.load %arg3[%c1, %c0_6, %c0_7] : memref<2x8x128xf32, #tpu.memory_space<vmem>>, vector<1x8x128xf32>
    %8 = vector.shape_cast %7 : vector<1x8x128xf32> to vector<8x128xf32>
    %9 = arith.addf %6, %8 : vector<8x128xf32>
    %cst_8 = arith.constant 5.000000e-01 : f32
    %10 = vector.broadcast %cst_8 : f32 to vector<8x128xf32>
    %11 = arith.mulf %9, %10 : vector<8x128xf32>
    %12 = math.cos %11 : vector<8x128xf32>
    %13 = vector.broadcast %0 : f32 to vector<8x128xf32>
    %14 = arith.mulf %13, %12 : vector<8x128xf32>
    %15 = vector.broadcast %4 : f32 to vector<8x128xf32>
    %16 = arith.subf %15, %14 : vector<8x128xf32>
    %c0_9 = arith.constant 0 : index
    %c0_10 = arith.constant 0 : index
    %17 = vector.load %arg4[%c0_9, %c0_10] : memref<8x128xf32, #tpu.memory_space<vmem>>, vector<8x128xf32>
    tpu.vector_store %arg4[%c0_9, %c0_10], %16 {strides = array<i32>} : memref<8x128xf32, #tpu.memory_space<vmem>>, vector<8x128xf32>,
    return
  }
  func.func @transform_0(%arg0: i32) -> (i32, i32) {
    %c0_i32 = arith.constant 0 : i32
    %c0_i32_0 = arith.constant 0 : i32
    %c0_i32_1 = arith.constant 0 : i32
    return %c0_i32, %c0_i32_0 : i32, i32
  }
  func.func @transform_1(%arg0: i32) -> (i32, i32) {
    %c0_i32 = arith.constant 0 : i32
    %c0_i32_0 = arith.constant 0 : i32
    %c0_i32_1 = arith.constant 0 : i32
    return %c0_i32, %c0_i32_0 : i32, i32
  }
  func.func @transform_2(%arg0: i32) -> (i32, i32, i32) {
    %c0_i32 = arith.constant 0 : i32
    %c0_i32_0 = arith.constant 0 : i32
    %c0_i32_1 = arith.constant 0 : i32
    return %c0_i32, %arg0, %c0_i32_0 : i32, i32, i32
  }
  func.func @transform_3(%arg0: i32) -> (i32, i32) {
    %c0_i32 = arith.constant 0 : i32
    %c0_i32_0 = arith.constant 0 : i32
    return %arg0, %c0_i32 : i32, i32
  }
}

</mosaic_0001>

<bundles_post_ra>
// kernel: action_piece.3
= control target key start
LH: loop header
LB: loop body
LE: loop exit
PB: predicated region body
PF: predicated region fallthrough
CT: control target
= control target key end

     0   :  { %v220_v26 = vmov 683565275   ;;  %v221_v28 = vmov 2475754826   ;;  %v222_v30 = vmov 2131351028   ;;  %s327_s0 = inlined_call_operand.<no memory space> [shape: f32[1,1], index: 0, kind: input, shape index: {}]   ;;  %s328_s2 = inlined_call_operand.vmem [shape: f32[2,8,128], index: 2, kind: input, shape index: {}]   ;;  %s329_s1 = inlined_call_operand.<no memory space> [shape: f32[1,1], index: 1, kind: input, shape index: {}]   ;;  %s330_s3 = inlined_call_operand.vmem [shape: f32[8,128], index: 3, kind: output, shape index: {}]  }
   0x1   :  { %v250_v0 = vstv %s327_s0  ;;  %v37_v1 = vld [vmem:[%s328_s2] sm:$0xff]  ;;  %v205_v2 = vld [vmem:[%s328_s2 + $0x8] sm:$0xff]  ;;  %v223_v32 = vmov 2102212464   ;;  %v224_v34 = vmov 920167782  }
   0x2   :  { %218 = vrcp.f32 %v250_v0  ;;  %v40_v3 = vadd.f32 %v205_v2, %v37_v1  ;;  %vm24_vm0 = vweird.f32 %v250_v0  ;;  %v30_v9 = vand.u32 2147483648, %v250_v0 }
   0x3   :  { %v28_v12 = vand.u32 2147483647, %v250_v0  ;;  %v225_v40 = vmov 1326507024  }
   0x4   :  { %v259_v4 = vmul.f32 0.5, %v40_v3  ;;  %v31_v16 = vor.u32 1.1754944e-38, %v30_v9 }
   0x5   :  { %vm29_vm3 = vcmp.eq.f32.partialorder %v28_v12, 8.507059e+37 }
   0x6   :  { %v45_v5 = vand.u32 2139095040, %v259_v4  ;;  %v42_v10 = vand.u32 2147483647, %v259_v4 }
   0x8   :  { %v219_v6 = vpop.eup %218  ;;  %v46_v8 = vshrl.u32 %v45_v5, 23  ;;  %v49_v17 = vand.u32 8388607, %v42_v10 }
   0x9   :  { %v20_v7 = vmul.f32 %v219_v6, %v250_v0  ;;  %vm25_vm1 = vweird.f32 %v219_v6 }
   0xa   :  { %v206_v13 = vadd.s32 4294967169, %v46_v8  ;;  %vm26_vm2 = vmor %vm24_vm0, %vm25_vm1  ;;  %v50_v23 = vor.u32 8388608, %v49_v17  ;;  %v226_v17 = vmov 0   ;;  %vm44_vm0 = vcmp.lt.s32.totalorder %v259_v4, 0 }
   0xb   :  { %v21_v11 = vsub.f32 1.0, %v20_v7  ;;  %vm307_vm1 = vcmp.le.f32.partialorder %v42_v10, 0.7853982 }
   0xc   :  { %v52_v15 = vadd.s32 1, %v206_v13  ;;  %v272_v42 = vshll.u32 %v50_v23, 8 }
   0xd   :  { %v22_v14 = vmul.f32 %v219_v6, %v21_v11 }
   0xe   :  { %vm53_vm4 = vcmp.gt.s32.totalorder %v52_v15, 0  ;;  %v91_v54 = vand.u32 65535, %v272_v42  ;;  %v92_v55 = vshrl.u32 %v272_v42, 16 }
   0xf   :  { %v23_v18 = vadd.f32 %v219_v6, %v22_v14  ;;  %v54_v19 = vsel %vm53_vm4, %v52_v15, 0 }
  0x10   :  { %v56_v21 = vand.u32 31, %v54_v19  ;;  %v269_v24 = vshrl.u32 %v54_v19, 5 }
  0x11   :  { %v27_v20 = vsel %vm26_vm2, %v219_v6, %v23_v18 }
  0x12   :  { %v32_v22 = vsel %vm29_vm3, %v31_v16, %v27_v20  ;;  %v57_v25 = vsub.s32 32, %v56_v21  ;;  %v59_v27 = vshll.u32 %v220_v26, %v56_v21  ;;  %v62_v29 = vshll.u32 %v221_v28, %v56_v21 }
  0x13   :  { %209 = vpush %v32_v22  ;;  %v65_v31 = vshll.u32 %v222_v30, %v56_v21  ;;  %v68_v33 = vshll.u32 %v223_v32, %v56_v21  ;;  %v71_v35 = vshll.u32 %v224_v34, %v56_v21  ;;  %vm74_vm5 = vcmp.lt.s32.totalorder %v269_v24, 1 }
  0x14   :  { %v60_v36 = vshrl.u32 %v221_v28, %v57_v25  ;;  %v63_v37 = vshrl.u32 %v222_v30, %v57_v25  ;;  %v66_v38 = vshrl.u32 %v223_v32, %v57_v25  ;;  %v69_v39 = vshrl.u32 %v224_v34, %v57_v25 }
  0x15   :  { %v72_v41 = vshrl.u32 %v225_v40, %v57_v25  ;;  %vm77_vm6 = vcmp.lt.s32.totalorder %v269_v24, 4  ;;  %vm76_vm7 = vcmp.lt.s32.totalorder %v269_v24, 3  ;;  %vm75_vm8 = vcmp.lt.s32.totalorder %v269_v24, 2 }
  0x16   :  { %v61_v43 = vor.u32 %v60_v36, %v59_v27  ;;  %v64_v44 = vor.u32 %v63_v37, %v62_v29  ;;  %v67_v45 = vor.u32 %v66_v38, %v65_v31  ;;  %v70_v46 = vor.u32 %v69_v39, %v68_v33 }
  0x17   :  { %v73_v47 = vor.u32 %v72_v41, %v71_v35  ;;  %v58_v62 = vshrl.u32 %v220_v26, %v57_v25 }
  0x18   :  { %v82_v48 = vsel %vm74_vm5, %v61_v43, %v64_v44  ;;  %v86_v49 = vsel %vm74_vm5, %v64_v44, %v67_v45  ;;  %v83_v50 = vsel %vm77_vm6, %v70_v46, 920167782  ;;  %v79_v16 = vsel %vm77_vm6, %v67_v45, 2102212464 }
  0x19   :  { %v87_v51 = vsel %vm77_vm6, %v73_v47, 1326507024  ;;  %v84_v52 = vsel %vm76_vm7, %v67_v45, %v83_v50  ;;  %v78_v14 = vsel %vm74_vm5, %v58_v62, %v61_v43  ;;  %v80_v27 = vsel %vm76_vm7, %v64_v44, %v79_v16 }
  0x1a   :  { %v88_v53 = vsel %vm76_vm7, %v70_v46, %v87_v51  ;;  %v85_v56 = vsel %vm75_vm8, %v82_v48, %v84_v52  ;;  %v81_v35 = vsel %vm75_vm8, %v78_v14, %v80_v27  ;;  %vm185_vm5 = vweird.f32 %v259_v4 }
  0x1b   :  { %v89_v57 = vsel %vm75_vm8, %v86_v49, %v88_v53  ;;  %v115_v60 = vand.u32 65535, %v85_v56  ;;  %v116_v61 = vshrl.u32 %v85_v56, 16  ;;  %v135_v39 = vmul.u32 %v272_v42, %v81_v35 }
  0x1c   :  { %v93_v58 = vand.u32 65535, %v89_v57  ;;  %v94_v59 = vshrl.u32 %v89_v57, 16 }
  0x1d   :  { %v117_v3 = vmul.u32 %v115_v60, %v91_v54  ;;  %v118_v5 = vmul.u32 %v116_v61, %v91_v54  ;;  %v119_v6 = vmul.u32 %v115_v60, %v92_v55  ;;  %v120_v11 = vmul.u32 %v116_v61, %v92_v55 }
  0x1e   :  { %v95_v63 = vmul.u32 %v93_v58, %v91_v54  ;;  %v96_v1 = vmul.u32 %v94_v59, %v91_v54  ;;  %v97_v2 = vmul.u32 %v93_v58, %v92_v55  ;;  %v98_v7 = vmul.u32 %v94_v59, %v92_v55 }
  0x1f   :  { %v121_v12 = vshll.u32 %v118_v5, 16  ;;  %v123_v13 = vshll.u32 %v119_v6, 16  ;;  %v122_v25 = vshrl.u32 %v118_v5, 16  ;;  %v124_v31 = vshrl.u32 %v119_v6, 16 }
  0x20   :  { %v99_v8 = vshll.u32 %v96_v1, 16  ;;  %v101_v9 = vshll.u32 %v97_v2, 16  ;;  %v100_v20 = vshrl.u32 %v96_v1, 16  ;;  %v102_v28 = vshrl.u32 %v97_v2, 16 }
  0x21   :  { %vm125_vm10 = vc.u32 %v117_v3, %v121_v12  ;;  %v127_v19 = vadd.s32 %v121_v12, %v117_v3 }
  0x22   :  { %vm103_vm9 = vc.u32 %v95_v63, %v99_v8  ;;  %v105_v15 = vadd.s32 %v99_v8, %v95_v63  ;;  %v126_v22 = vsel %vm125_vm10, 1, %v226_v17 }
  0x23   :  { %v104_v18 = vsel %vm103_vm9, 1, %v226_v17  ;;  %v128_v26 = vadd.s32 %v126_v22, %v120_v11  ;;  %vm129_vm12 = vc.u32 %v127_v19, %v123_v13  ;;  %v131_v34 = vadd.s32 %v127_v19, %v123_v13 }
  0x24   :  { %v106_v21 = vadd.s32 %v104_v18, %v98_v7  ;;  %vm107_vm11 = vc.u32 %v105_v15, %v101_v9  ;;  %v130_v30 = vsel %vm129_vm12, 1, %v226_v17 }
  0x25   :  { %v108_v23 = vsel %vm107_vm11, 1, %v226_v17  ;;  %v132_v32 = vadd.s32 %v130_v30, %v128_v26 }
  0x26   :  { %v110_v29 = vadd.s32 %v108_v23, %v106_v21 }
  0x27   :  { %v133_v36 = vadd.s32 %v132_v32, %v122_v25 }
  0x28   :  { %v111_v33 = vadd.s32 %v110_v29, %v100_v20 }
  0x29   :  { %v134_v38 = vadd.s32 %v133_v36, %v124_v31 }
  0x2a   :  { %v112_v37 = vadd.s32 %v111_v33, %v102_v28 }
  0x2b   :  { %v138_v40 = vadd.s32 1, %v134_v38 }
  0x2c   :  { %vm137_vm13 = vc.u32 %v112_v37, %v131_v34  ;;  %v136_v24 = vadd.s32 %v131_v34, %v112_v37 }
  0x2d   :  { %v139_v41 = vsel %vm137_vm13, %v138_v40, %v134_v38 }
  0x2e   :  { %v140_v43 = vadd.s32 %v139_v41, %v135_v39 }
  0x30   :  { %v141_v44 = vadd.s32 536870912, %v140_v43 }
  0x32   :  { %v142_v45 = vshrl.u32 %v141_v44, 30 }
  0x34   :  { %v143_v46 = vshll.u32 %v142_v45, 30  ;;  %v166_v3 = vsub.s32 4, %v142_v45 }
  0x36   :  { %v144_v47 = vsub.s32 %v140_v43, %v143_v46  ;;  %v167_v9 = vsel %vm44_vm0, %v166_v3, %v142_v45 }
  0x37   :  { %v169_v10 = vsel %vm307_vm1, 0, %v167_v9 }
  0x38   :  { %vm145_vm14 = vcmp.lt.s32.totalorder %v144_v47, 0  ;;  %v146_v48 = vsub.s32 0, %v144_v47  ;;  %v186_v17 = vand.u32 3, %v169_v10 }
  0x3a   :  { %v147_v49 = vsel %vm145_vm14, %v146_v48, %v144_v47  ;;  %vm191_vm2 = vcmp.eq.s32.totalorder %v186_v17, 2  ;;  %vm188_vm3 = vcmp.eq.s32.totalorder %v186_v17, 0  ;;  %vm187_vm4 = vcmp.lt.s32.totalorder %v186_v17, 2 }
  0x3b   :  { %v148_v50 = vclz %v147_v49 }
  0x3d   :  { %v207_v51 = vadd.s32 4294967294, %v148_v50 }
  0x3f   :  { %vm208_vm15 = vcmp.lt.s32.totalorder %v207_v51, 0 }
  0x40   :  { %v151_v52 = vsel %vm208_vm15, 0, %v207_v51 }
  0x41   :  { %v152_v53 = vsub.s32 32, %v151_v52  ;;  %v153_v54 = vshll.u32 %v144_v47, %v151_v52  ;;  %v156_v55 = vsub.s32 4294967266, %v151_v52 }
  0x43   :  { %v154_v42 = vshrl.u32 %v136_v24, %v152_v53  ;;  %v157_v56 = vadd.s32 127, %v156_v55 }
  0x44   :  { %s210_s2 = spop %209 }
  0x45   :  { %v155_v57 = vor.u32 %v154_v42, %v153_v54  ;;  %v158_v58 = vshll.u32 %v157_v56, 23  ;;  %s34_s18 = smul.f32 0.005, %s210_s2 }
  0x47   :  { %v159_v59 = vor.u32 4788187, %v158_v58  ;;  %v162_v60 = vcvt.s32.f32 %v155_v57  ;;  %s35_s21 = smul.f32 %s34_s18, %s329_s1 }
  0x49   :  { %v160_v61 = vand.u32 2147483647, %v159_v59  ;;  %s36_s24 = sadd.f32 %s35_s21, %s327_s0 }
  0x4b   :  { %v163_v62 = vmul.f32 %v162_v60, %v160_v61  ;;  %v198_v30 = vstv %s36_s24 }
  0x4d   :  { %v164_v1 = vxor.u32 2147483648, %v163_v62 }
  0x4f   :  { %v165_v2 = vsel %vm44_vm0, %v164_v1, %v163_v62 }
  0x50   :  { %v168_v5 = vsel %vm307_vm1, %v259_v4, %v165_v2 }
  0x51   :  { %v170_v6 = vmul.f32 %v168_v5, %v168_v5 }
  0x53   :  { %v171_v7 = vmul.f32 -0.001358992, %v170_v6  ;;  %v178_v8 = vmul.f32 -0.00019511016, %v170_v6 }
  0x55   :  { %v172_v11 = vadd.f32 0.041655596, %v171_v7  ;;  %v179_v12 = vadd.f32 0.008332121, %v178_v8 }
  0x57   :  { %v173_v13 = vmul.f32 %v172_v11, %v170_v6  ;;  %v180_v14 = vmul.f32 %v179_v12, %v170_v6 }
  0x59   :  { %v174_v15 = vadd.f32 -0.4999988, %v173_v13  ;;  %v181_v16 = vadd.f32 -0.16666654, %v180_v14 }
  0x5b   :  { %v175_v18 = vmul.f32 %v174_v15, %v170_v6  ;;  %v182_v19 = vmul.f32 %v181_v16, %v170_v6 }
  0x5d   :  { %v176_v20 = vadd.f32 1.0, %v175_v18  ;;  %v183_v21 = vadd.f32 1.0, %v182_v19 }
  0x5f   :  { %v184_v22 = vmul.f32 %v183_v21, %v168_v5  ;;  %v192_v23 = vxor.u32 2147483648, %v176_v20 }
  0x61   :  { %v189_v25 = vxor.u32 2147483648, %v184_v22  ;;  %v193_v26 = vsel %vm191_vm2, %v192_v23, %v184_v22 }
  0x63   :  { %v190_v27 = vsel %vm188_vm3, %v176_v20, %v189_v25 }
  0x64   :  { %v194_v28 = vsel %vm187_vm4, %v190_v27, %v193_v26 }
  0x65   :  { %v195_v29 = vsel %vm185_vm5, nan, %v194_v28 }
  0x66   :  { %v197_v31 = vmul.f32 %v195_v29, %v250_v0 }
  0x68   :  { %v199_v32 = vsub.f32 %v198_v30, %v197_v31 }
  0x6a   :  { %200 = vst [vmem:[%s330_s3] sm:$0xff] %v199_v32 }

// kernel: action_piece.2
= control target key start
LH: loop header
LB: loop body
LE: loop exit
PB: predicated region body
PF: predicated region fallthrough
CT: control target
= control target key end

     0   :  { %s104_s0 = inlined_call_operand.vmem [shape: f32[2,8,128], index: 0, kind: input, shape index: {}]   ;;  %s105_s1 = inlined_call_operand.hbm [shape: f32[1,1], index: 1, kind: output, shape index: {}]  }
   0x1   :  { %v50_v0 = vld [vmem:[%s104_s0 + $0x8] sm:$0xff]  ;;  %v17_v1 = vld [vmem:[%s104_s0] sm:$0xff] }
   0x2   :  { %6 = vsyncpa [#allocation3], 0  ;;  %v18_v2 = vsub.f32 %v50_v0, %v17_v1  ;;  %vm13_vm0 = vcmask 0   ;;  %v81_v4 = vmov 0.0   ;;  %s82_s10 = smov [#allocation2]   ;;  %s41_s13 = sshll.u32 %s105_s1, 4  ;;  %s42_s13 = int_to_ptr.hbm [resolvable:$true] %s41_s13 }
   0x3   :  { %14 = vst.msk [vmem:[#allocation2] sm:$0x1] %vm13_vm0, %v81_v4  ;;  %s39_s11 = sshll.u32 %s82_s10, 4  ;;  %s40_s11 = int_to_ptr.vmem [resolvable:$true] %s39_s11 }
   0x4   :  { %v20_v3 = vmul.f32 %v18_v2, %v18_v2 }
   0x6   :  { %21 = vadd.xlane.f32.xlu0 %v20_v3 }
   0xa   :  { %v19_v12 = vld [vmem:[#allocation2] sm:$0x1] }
  0x79   :  { %v22_v5 = vpop.xlane.xlu0 %21 }
  0x7a   :  { %v23_v6 = vrot.slane %v22_v5, 4 }
  0x7c   :  { %v24_v7 = vadd.f32 %v23_v6, %v22_v5 }
  0x7e   :  { %v25_v8 = vrot.slane %v24_v7, 2 }
  0x80   :  { %v26_v9 = vadd.f32 %v25_v8, %v24_v7 }
  0x82   :  { %v27_v10 = vrot.slane %v26_v9, 1 }
  0x84   :  { %v28_v11 = vadd.f32 %v27_v10, %v26_v9 }
  0x86   :  { %51 = vpush %v28_v11 }
  0xb7   :  { %s52_s14 = spop %51 }
  0xb8   :  { %v30_v13 = vstv %s52_s14 }
  0xb9   :  { %v31_v14 = vadd.f32 %v30_v13, %v19_v12 }
  0xbb   :  { %33 = vst.msk [vmem:[#allocation2] sm:$0x1] %vm13_vm0, %v31_v14 }
  0xbc   :  { %44 = dma.vmem_to_hbm [thread:$0]  %s40_s11, 16, %s42_s13, [#allocation3]  }
  0xbd   :  { %79 = dma.done.wait [#allocation3], 16  }
  0xbe   :  { %80 = vsyncadd [#allocation3], 4294967280 }
  0xbf   :  { %49 = vsyncpa [#allocation3], 1 }

</bundles_post_ra>
